<compile_context>
chip_gen: v7x
topology: tpu7x:2x2x1
jax: 0.10.0
libtpu: 0.0.40
codegen_flags: <defaults>
</compile_context>

<pallas_src>
import functools

import jax
import jax.numpy as jnp
from jax.experimental import pallas as pl
from jax.experimental.pallas import tpu as pltpu


def _round_up(x: int, m: int) -> int:
    return ((x + m - 1) // m) * m


def _pick_tile(batch: int, tile_b: int) -> int:
    """Batch-tile size: multiple of 8, capped at tile_b, >=2 tiles when useful."""
    if batch <= 8:
        return 8
    # Prefer a 2-way split (engages both TensorCores on v7x) while keeping the
    # last-tile padding waste small; cap at tile_b for very large batches.
    two_way = _round_up(pl.cdiv(batch, 2), 8)
    return min(tile_b, two_way)


def _qnet_kernel(x_ref, w1_ref, b1_ref, w2_ref, b2_ref, out_ref):
    # fc1: cast x to bf16 in-kernel, (tile, K) @ (K, H) with f32 accumulation,
    # then bias + ReLU in f32 on the VPU.
    x = x_ref[...].astype(w1_ref.dtype)
    h = jnp.dot(x, w1_ref[...], preferred_element_type=jnp.float32)
    h = jnp.maximum(h + b1_ref[...], 0.0)
    # fc2: (tile, H) @ (H, action_dim) -> f32 accumulate, f32 bias, store.
    q = jnp.dot(h.astype(w2_ref.dtype), w2_ref[...],
                preferred_element_type=jnp.float32)
    out_ref[...] = (q + b2_ref[...]).astype(out_ref.dtype)


@functools.partial(jax.jit, static_argnames=("tile_b",))
def snake_q_network(x, w1, b1, w2, b2, *, tile_b=2048):
    """Forward pass of SnakeQNetwork.

    x:  (B, state_dim) float32 (or bf16)
    w1: (state_dim, 64) bf16, b1: (1, 64) float32
    w2: (64, action_dim) bf16, b2: (1, action_dim) float32
    returns (B, action_dim) float32 Q-values.
    """
    B, state_dim = x.shape
    hidden = w1.shape[1]
    action_dim = w2.shape[1]

    tile = _pick_tile(B, tile_b)
    grid = (pl.cdiv(B, tile),)

    cost = pl.CostEstimate(
        flops=2 * B * (state_dim * hidden + hidden * action_dim),
        transcendentals=0,
        bytes_accessed=(B * state_dim * x.dtype.itemsize          # x
                        + state_dim * hidden * w1.dtype.itemsize  # w1
                        + hidden * action_dim * w2.dtype.itemsize  # w2
                        + (hidden + action_dim) * 4               # biases
                        + B * action_dim * 4),                    # out
    )

    out = pl.pallas_call(
        _qnet_kernel,
        out_shape=jax.ShapeDtypeStruct((B, action_dim), jnp.float32),
        grid=grid,
        in_specs=[
            # x: batch-tiled; last dim == full array dim (16) -> legal block.
            pl.BlockSpec((tile, state_dim), lambda i: (i, 0)),
            # Weights / biases: resident across the whole grid.
            pl.BlockSpec((state_dim, hidden), lambda i: (0, 0)),
            pl.BlockSpec((1, hidden), lambda i: (0, 0)),
            pl.BlockSpec((hidden, action_dim), lambda i: (0, 0)),
            pl.BlockSpec((1, action_dim), lambda i: (0, 0)),
        ],
        # Unpadded, lane-narrow output: last dim == full array dim (4).
        out_specs=pl.BlockSpec((tile, action_dim), lambda i: (i, 0)),
        compiler_params=pltpu.CompilerParams(
            dimension_semantics=("parallel",)),  # v7x: shard batch over 2 TCs
        cost_estimate=cost,
    )(x, w1, b1, w2, b2)
    return out


def init_params(key, state_dim, hidden, action_dim,
                weight_dtype=jnp.bfloat16):
    """PyTorch nn.Linear-style U[-1/sqrt(fan_in), 1/sqrt(fan_in)] init.

    Weights are cast to bf16 ONCE here (not per forward call); biases stay f32
    for the f32 epilogue inside the kernel.
    """
    k1, k2, k3, k4 = jax.random.split(key, 4)
    bound1 = 1.0 / jnp.sqrt(jnp.float32(state_dim))
    bound2 = 1.0 / jnp.sqrt(jnp.float32(hidden))
    w1 = jax.random.uniform(k1, (state_dim, hidden), jnp.float32, -bound1, bound1)
    b1 = jax.random.uniform(k2, (1, hidden), jnp.float32, -bound1, bound1)
    w2 = jax.random.uniform(k3, (hidden, action_dim), jnp.float32, -bound2, bound2)
    b2 = jax.random.uniform(k4, (1, action_dim), jnp.float32, -bound2, bound2)
    return w1.astype(weight_dtype), b1, w2.astype(weight_dtype), b2


def _reference(x, w1, b1, w2, b2):
    """Pure-JAX reference emulating the kernel's bf16-input / f32-accum math."""
    xc = x.astype(jnp.bfloat16).astype(jnp.float32)
    w1f = w1.astype(jnp.float32)
    w2f = w2.astype(jnp.float32)
    h = jnp.maximum(xc @ w1f + b1, 0.0)
    h = h.astype(jnp.bfloat16).astype(jnp.float32)
    return h @ w2f + b2


if __name__ == "__main__":
    # Small shapes consistent with a Snake env: state_dim=16 features, 4 actions.
    batch, state_dim, hidden, action_dim = 8, 16, 64, 4

    key = jax.random.PRNGKey(0)
    kx, kp = jax.random.split(key)
    x = jax.random.normal(kx, (batch, state_dim), jnp.float32)
    w1, b1, w2, b2 = init_params(kp, state_dim, hidden, action_dim)

    out = jax.block_until_ready(snake_q_network(x, w1, b1, w2, b2))
    assert out.shape == (batch, action_dim)

    ref = _reference(x, w1, b1, w2, b2)
    assert jnp.allclose(out, ref, atol=1e-2, rtol=1e-2), (
        f"max abs err {jnp.max(jnp.abs(out - ref))}")

    # Training-sized batch, non-multiple of the tile: exercises the 2-way tile
    # split (v7x megacore) and the partial last block (masked OOB stores).
    big_b = 1064
    xb = jax.random.normal(kx, (big_b, state_dim), jnp.float32)
    out_big = jax.block_until_ready(snake_q_network(xb, w1, b1, w2, b2))
    assert out_big.shape == (big_b, action_dim)
    ref_big = _reference(xb, w1, b1, w2, b2)
    assert jnp.allclose(out_big, ref_big, atol=1e-2, rtol=1e-2), (
        f"max abs err {jnp.max(jnp.abs(out_big - ref_big))}")

    print("KERNEL_OK")
</pallas_src>

<mosaic_0001>
module attributes {stable_mosaic.version = 11 : i64} {
  func.func @_qnet_kernel(%arg0: i32, %arg1: memref<8x16xf32, #tpu.memory_space<vmem>>, %arg2: memref<16x64xbf16, #tpu.memory_space<vmem>>, %arg3: memref<1x64xf32, #tpu.memory_space<vmem>>, %arg4: memref<64x4xbf16, #tpu.memory_space<vmem>>, %arg5: memref<1x4xf32, #tpu.memory_space<vmem>>, %arg6: memref<8x4xf32, #tpu.memory_space<vmem>>) attributes {dimension_semantics = [#tpu.dimension_semantics<parallel>], iteration_bounds = array<i64: 1>, scalar_prefetch = 0 : i64, scratch_operands = 0 : i64, tpu.core_type = #tpu.core_type<tc>, window_params = [{transform_indices = @transform_0, window_bounds = array<i64: 8, 16>}, {pipeline_mode = #tpu.pipeline_mode<synchronous>, transform_indices = @transform_1, window_bounds = array<i64: 16, 64>}, {pipeline_mode = #tpu.pipeline_mode<synchronous>, transform_indices = @transform_2, window_bounds = array<i64: 1, 64>}, {pipeline_mode = #tpu.pipeline_mode<synchronous>, transform_indices = @transform_3, window_bounds = array<i64: 64, 4>}, {pipeline_mode = #tpu.pipeline_mode<synchronous>, transform_indices = @transform_4, window_bounds = array<i64: 1, 4>}, {transform_indices = @transform_5, window_bounds = array<i64: 8, 4>}]} {
    %c0 = arith.constant 0 : index
    %c0_0 = arith.constant 0 : index
    %0 = vector.load %arg1[%c0, %c0_0] : memref<8x16xf32, #tpu.memory_space<vmem>>, vector<8x16xf32>
    %1 = arith.truncf %0 : vector<8x16xf32> to vector<8x16xbf16>
    %c0_1 = arith.constant 0 : index
    %c0_2 = arith.constant 0 : index
    %2 = vector.load %arg2[%c0_1, %c0_2] : memref<16x64xbf16, #tpu.memory_space<vmem>>, vector<16x64xbf16>
    %cst = arith.constant dense<0.000000e+00> : vector<8x64xf32>
    %3 = tpu.matmul %1, %2, %cst {dimension_numbers = #tpu.dot_dimension_numbers<[1], [0], [0], [1], [0, 0, 1, 1], [], []>} : vector<8x16xbf16>, vector<16x64xbf16>, vector<8x64xf32> -> vector<8x64xf32>
    %c0_3 = arith.constant 0 : index
    %c0_4 = arith.constant 0 : index
    %4 = vector.load %arg3[%c0_3, %c0_4] : memref<1x64xf32, #tpu.memory_space<vmem>>, vector<1x64xf32>
    %5 = vector.broadcast %4 : vector<1x64xf32> to vector<8x64xf32>
    %6 = arith.addf %3, %5 : vector<8x64xf32>
    %cst_5 = arith.constant 0.000000e+00 : f32
    %7 = vector.broadcast %cst_5 : f32 to vector<8x64xf32>
    %8 = arith.maximumf %6, %7 : vector<8x64xf32>
    %9 = arith.truncf %8 : vector<8x64xf32> to vector<8x64xbf16>
    %c0_6 = arith.constant 0 : index
    %c0_7 = arith.constant 0 : index
    %10 = vector.load %arg4[%c0_6, %c0_7] : memref<64x4xbf16, #tpu.memory_space<vmem>>, vector<64x4xbf16>
    %cst_8 = arith.constant dense<0.000000e+00> : vector<8x4xf32>
    %11 = tpu.matmul %9, %10, %cst_8 {dimension_numbers = #tpu.dot_dimension_numbers<[1], [0], [0], [1], [0, 0, 1, 1], [], []>} : vector<8x64xbf16>, vector<64x4xbf16>, vector<8x4xf32> -> vector<8x4xf32>
    %c0_9 = arith.constant 0 : index
    %c0_10 = arith.constant 0 : index
    %12 = vector.load %arg5[%c0_9, %c0_10] : memref<1x4xf32, #tpu.memory_space<vmem>>, vector<1x4xf32>
    %13 = vector.broadcast %12 : vector<1x4xf32> to vector<8x4xf32>
    %14 = arith.addf %11, %13 : vector<8x4xf32>
    %c0_11 = arith.constant 0 : index
    %c0_12 = arith.constant 0 : index
    %15 = vector.load %arg6[%c0_11, %c0_12] : memref<8x4xf32, #tpu.memory_space<vmem>>, vector<8x4xf32>
    tpu.vector_store %arg6[%c0_11, %c0_12], %14 {strides = array<i32>} : memref<8x4xf32, #tpu.memory_space<vmem>>, vector<8x4xf32>,
    return
  }
  func.func @transform_0(%arg0: i32) -> (i32, i32) {
    %c0_i32 = arith.constant 0 : i32
    %c0_i32_0 = arith.constant 0 : i32
    return %arg0, %c0_i32 : i32, i32
  }
  func.func @transform_1(%arg0: i32) -> (i32, i32) {
    %c0_i32 = arith.constant 0 : i32
    %c0_i32_0 = arith.constant 0 : i32
    %c0_i32_1 = arith.constant 0 : i32
    return %c0_i32, %c0_i32_0 : i32, i32
  }
  func.func @transform_2(%arg0: i32) -> (i32, i32) {
    %c0_i32 = arith.constant 0 : i32
    %c0_i32_0 = arith.constant 0 : i32
    %c0_i32_1 = arith.constant 0 : i32
    return %c0_i32, %c0_i32_0 : i32, i32
  }
  func.func @transform_3(%arg0: i32) -> (i32, i32) {
    %c0_i32 = arith.constant 0 : i32
    %c0_i32_0 = arith.constant 0 : i32
    %c0_i32_1 = arith.constant 0 : i32
    return %c0_i32, %c0_i32_0 : i32, i32
  }
  func.func @transform_4(%arg0: i32) -> (i32, i32) {
    %c0_i32 = arith.constant 0 : i32
    %c0_i32_0 = arith.constant 0 : i32
    %c0_i32_1 = arith.constant 0 : i32
    return %c0_i32, %c0_i32_0 : i32, i32
  }
  func.func @transform_5(%arg0: i32) -> (i32, i32) {
    %c0_i32 = arith.constant 0 : i32
    %c0_i32_0 = arith.constant 0 : i32
    return %arg0, %c0_i32 : i32, i32
  }
}

</mosaic_0001>

<bundles_post_ra>
// kernel: snake_q_network.1
= control target key start
LH: loop header
LB: loop body
LE: loop exit
PB: predicated region body
PF: predicated region fallthrough
CT: control target
= control target key end

     0   :  { %v214_v0 = vmov 0.0   ;;  %vm215_vm0 = vmmov 0   ;;  %vm38_vm1 = vcmask 130048   ;;  %vm123_vm2 = vcmask 523264   ;;  %s273_s1 = inlined_call_operand.vmem [shape: bf16[16,64], index: 1, kind: input, shape index: {}]   ;;  %s274_s0 = inlined_call_operand.vmem [shape: f32[8,16], index: 0, kind: input, shape index: {}]   ;;  %s275_s3 = inlined_call_operand.vmem [shape: bf16[64,4], index: 3, kind: input, shape index: {}]   ;;  %s276_s2 = inlined_call_operand.vmem [shape: f32[1,64], index: 2, kind: input, shape index: {}]   ;;  %s277_s4 = inlined_call_operand.vmem [shape: f32[1,4], index: 4, kind: input, shape index: {}]   ;;  %s278_s5 = inlined_call_operand.vmem [shape: f32[8,4], index: 5, kind: output, shape index: {}]  }
   0x1   :  { %189 = vmatprep.subr.bf16.mxu0 %v214_v0  ;;  %v209_v1 = vld [vmem:[%s273_s1] sm:$0xff]   ;;  %191 = vmatprep.mubr.msk.bf16.mxu0 %vm215_vm0, %v214_v0  ;;  %v211_v5 = vld [vmem:[%s275_s3 + $0x8] sm:$0xff]   ;;  %v212_v6 = vld [vmem:[%s275_s3 + $0x10] sm:$0xff]   ;;  %vm167_vm3 = vcmask 31744  }
   0x2   :  { %v21_v2 = vld [vmem:[%s274_s0] sm:$0xff]  ;;  %195 = vmatprep.subr.bf16.mxu1 %v214_v0  ;;  %203 = vmatprep.mubr.msk.bf16.mxu1 %vm215_vm0, %v214_v0  ;;  %v213_v7 = vld [vmem:[%s275_s3 + $0x18] sm:$0xff]  }
   0x3   :  { %190 = vmatpush3.bf16.msra.mxu0 %v209_v1  ;;  %v22_v3 = vpack.c.bf16 %v21_v2, %v21_v2  ;;  %v210_v4 = vld [vmem:[%s275_s3] sm:$0xff]  }
   0x4   :  { %196 = vmatpush3.bf16.msra.mxu1 %v210_v4  ;;  %v173_v8 = vld [vmem:[%s276_s2] ss:$0 sm:$0xff] }
   0x5   :  { %197 = vmatprep.subr.bf16.mxu1 %v214_v0  ;;  %v176_v16 = vld [vmem:[%s277_s4] ss:$0 sm:$0xff] }
   0x6   :  { %192 = vmatmul.mubr.msk.bf16.vlgmr.msra.gmra.mrb[0].mxu0 %vm38_vm1, %v22_v3 }
   0x8   :  { %198 = vmatpush3.bf16.msra.mxu1 %v211_v5 }
   0x9   :  { %199 = vmatprep.subr.bf16.mxu1 %v214_v0 }
   0xc   :  { %200 = vmatpush3.bf16.msra.mxu1 %v212_v6 }
   0xd   :  { %201 = vmatprep.subr.bf16.mxu1 %v214_v0 }
  0x10   :  { %202 = vmatpush3.bf16.msra.mxu1 %v213_v7 }
  0xd9   :  { %v76_v9 = vpop.f32.mrb[0].mxu0 }
  0xda   :  { %v77_v10 = vadd.f32 %v173_v8, %v76_v9  ;;  %v193_v11 = vpop.f32.mrb[1].mxu0 }
  0xdb   :  { %v79_v12 = vpop.f32.mrb[2].mxu0 }
  0xdc   :  { %v82_v13 = vmax.f32 %v77_v10, 0.0  ;;  %v194_v14 = vpop.f32.mrb[3].mxu0 }
  0xde   :  { %v83_v15 = vpack.c.bf16 %v82_v13, %v82_v13 }
  0xe0   :  { %204 = vmatmul.mubr.msk.bf16.vlgmr.msra.gmra.mrb[0].mxu1 %vm123_vm2, %v83_v15 }
 0x1b3   :  { %v161_v17 = vpop.f32.mrb[0].mxu1 }
 0x1b4   :  { %v162_v18 = vadd.f32 %v176_v16, %v161_v17  ;;  %v205_v19 = vpop.f32.mrb[1].mxu1 }
 0x1b5   :  { %v164_v20 = vpop.f32.mrb[2].mxu1 }
 0x1b6   :  { %168 = vst.msk [vmem:[%s278_s5] sm:$0xff] %vm167_vm3, %v162_v18  ;;  %v206_v21 = vpop.f32.mrb[3].mxu1 }

</bundles_post_ra>
